<compile_context>
chip_gen: v5e
topology: v5e:2x2
jax: 0.10.0
libtpu: 0.0.40
codegen_flags: <defaults>
</compile_context>

<pallas_src>
import functools

import jax
import jax.numpy as jnp
from jax import lax
from jax.experimental import pallas as pl
from jax.experimental.pallas import tpu as pltpu


def _round_up(x, m):
    return (x + m - 1) // m * m


# ---------------------------------------------------------------------------
# Fused kernel: conv-as-matmul + batch stats + BatchNorm + ReLU
# ---------------------------------------------------------------------------
def _conv_bn_act_kernel(x_ref, w_ref, g_ref, b_ref, o_ref, sum_ref, sumsq_ref,
                        *, tm, inv_count, eps):
    i = pl.program_id(0)

    @pl.when(i == 0)
    def _():
        sum_ref[...] = jnp.zeros_like(sum_ref)
        sumsq_ref[...] = jnp.zeros_like(sumsq_ref)

    # Conv-as-matmul, lane-dense on M: (C_out, Kc) @ (Kc, tm) -> (C_out, tm).
    # The Conv2d bias is intentionally omitted: train-mode BatchNorm subtracts
    # the per-channel batch mean, so a per-channel bias cancels exactly.
    y = jnp.dot(w_ref[...], x_ref[...], preferred_element_type=jnp.float32)

    start = pl.multiple_of(i * tm, tm)
    o_ref[:, pl.ds(start, tm)] = y

    # Per-channel running sums for the BatchNorm batch statistics (f32).
    sum_ref[...] += jnp.sum(y, axis=1, keepdims=True)
    sumsq_ref[...] += jnp.sum(y * y, axis=1, keepdims=True)

    # Finalize: compute the per-channel affine once, then apply BN + ReLU to the
    # whole VMEM-resident output block in place (single HBM writeback at exit).
    @pl.when(i == pl.num_programs(0) - 1)
    def _():
        mean = sum_ref[...] * inv_count                     # (C_out, 1)
        var = sumsq_ref[...] * inv_count - mean * mean      # biased batch var
        inv_std = lax.rsqrt(var + eps)
        scale = g_ref[...] * inv_std                        # (C_out, 1)
        shift = b_ref[...] - mean * scale                   # (C_out, 1)
        o_ref[...] = jnp.maximum(o_ref[...] * scale + shift, 0.0)


# ---------------------------------------------------------------------------
# Wrapper
# ---------------------------------------------------------------------------
def conv_block_forward(x_nchw, weight, bias, gamma, beta, *,
                       padding, eps=1e-5, tile_m=2048):
    """ConvBlock forward: Conv2d -> BatchNorm2d (batch stats) -> ReLU.

    x_nchw : (N, C_in, H, W)      float32
    weight : (C_out, C_in, K, K)  float32
    bias   : (C_out,)             float32 (mathematically cancelled by BN)
    gamma  : (C_out,)             BatchNorm weight
    beta   : (C_out,)             BatchNorm bias
    """
    del bias  # cancelled exactly by train-mode BatchNorm (mean subtraction)

    N, C_in, H, W = x_nchw.shape
    C_out, _, K, _ = weight.shape
    p = padding
    Ho, Wo = H + 2 * p - K + 1, W + 2 * p - K + 1
    M = N * Ho * Wo
    Kc = C_in * K * K

    # ---- im2col (glue, plain JAX), transposed so M is the lane axis ----
    # TODO(synk): for production sizes, fuse im2col into the kernel (K*K shifted
    # (C_in, tm) accumulating matmuls over an NHWC HBM slab) to avoid writing a
    # K^2-inflated X_col to HBM.
    x_pad = jnp.pad(x_nchw, ((0, 0), (0, 0), (p, p), (p, p)))
    patches = [x_pad[:, :, kh:kh + Ho, kw:kw + Wo]
               for kh in range(K) for kw in range(K)]
    cols = jnp.stack(patches, axis=0)            # (K*K, N, C_in, Ho, Wo)
    cols = jnp.transpose(cols, (2, 0, 1, 3, 4))  # (C_in, K*K, N, Ho, Wo)
    x_t = cols.reshape(Kc, M).astype(jnp.float32)

    # ---- pick the M tile and pad M so it divides the tile ----
    tm = _round_up(min(tile_m, M), 128)
    M_pad = _round_up(M, tm)
    if M_pad != M:
        # Zero columns contribute exactly 0 to sum/sumsq (no conv bias), so the
        # stats stay correct as long as the kernel divides by the true M.
        x_t = jnp.pad(x_t, ((0, 0), (0, M_pad - M)))
    grid_m = M_pad // tm

    w_t = weight.reshape(C_out, Kc).astype(jnp.float32)        # (C_out, Kc)
    g_col = gamma.reshape(C_out, 1).astype(jnp.float32)
    b_col = beta.reshape(C_out, 1).astype(jnp.float32)
    # TODO(synk): on v6e/v7x at production sizes, cast x_t/w_t to bfloat16 (keep
    # preferred_element_type=f32 and all BN/stat math in f32) to halve the
    # dominant HBM stream into the MXU.

    kernel = functools.partial(
        _conv_bn_act_kernel,
        tm=tm,
        inv_count=float(1.0 / M),   # plain Python floats: compile-time consts
        eps=float(eps),
    )

    out_t = pl.pallas_call(
        kernel,
        out_shape=jax.ShapeDtypeStruct((C_out, M_pad), jnp.float32),
        grid_spec=pltpu.PrefetchScalarGridSpec(
            num_scalar_prefetch=0,
            grid=(grid_m,),
            in_specs=[
                pl.BlockSpec((Kc, tm), lambda i: (0, i)),      # X_col tile
                pl.BlockSpec((C_out, Kc), lambda i: (0, 0)),   # weights (resident)
                pl.BlockSpec((C_out, 1), lambda i: (0, 0)),    # gamma
                pl.BlockSpec((C_out, 1), lambda i: (0, 0)),    # beta
            ],
            # Output block = full (C_out, M_pad): resident in VMEM across the
            # (serial) M grid; BN + ReLU run in place at the last grid step, and
            # the block is written back to HBM exactly once.
            # TODO(synk): for M too large to keep resident in VMEM, fall back to
            # a two-pass structure (stats pass + normalize pass).
            out_specs=pl.BlockSpec((C_out, M_pad), lambda i: (0, 0)),
            scratch_shapes=[
                pltpu.VMEM((C_out, 1), jnp.float32),   # per-channel sum
                pltpu.VMEM((C_out, 1), jnp.float32),   # per-channel sum of sq.
            ],
        ),
        compiler_params=pltpu.CompilerParams(
            # Serial grid: accumulators + resident output depend on grid order.
            dimension_semantics=("arbitrary",),
        ),
    )(x_t, w_t, g_col, b_col)

    # (C_out, M) -> NCHW
    out = out_t[:, :M].reshape(C_out, N, Ho, Wo).transpose(1, 0, 2, 3)
    return out


# ---------------------------------------------------------------------------
# Pure-JAX reference (same semantics, keeps the conv bias) for a sanity check
# ---------------------------------------------------------------------------
def _reference(x_nchw, weight, bias, gamma, beta, *, padding, eps=1e-5):
    y = lax.conv_general_dilated(
        x_nchw, weight, window_strides=(1, 1),
        padding=[(padding, padding), (padding, padding)],
        dimension_numbers=("NCHW", "OIHW", "NCHW"))
    y = y + bias.reshape(1, -1, 1, 1)
    mean = jnp.mean(y, axis=(0, 2, 3), keepdims=True)
    var = jnp.mean((y - mean) ** 2, axis=(0, 2, 3), keepdims=True)  # biased
    y_hat = (y - mean) / jnp.sqrt(var + eps)
    y_hat = y_hat * gamma.reshape(1, -1, 1, 1) + beta.reshape(1, -1, 1, 1)
    return jnp.maximum(y_hat, 0.0)


if __name__ == "__main__":
    # ConvBlock(in_channels=4, out_channels=8, kernel_size=3, padding=1, act=nn.ReLU)
    N, C_in, H, W = 2, 4, 16, 16
    C_out, K, padding = 8, 3, 1

    key = jax.random.PRNGKey(0)
    k1, k2, k3, k4, k5 = jax.random.split(key, 5)
    x = jax.random.normal(k1, (N, C_in, H, W), jnp.float32)
    weight = 0.1 * jax.random.normal(k2, (C_out, C_in, K, K), jnp.float32)
    bias = 0.05 * jax.random.normal(k3, (C_out,), jnp.float32)
    gamma = 1.0 + 0.1 * jax.random.normal(k4, (C_out,), jnp.float32)
    beta = 0.1 * jax.random.normal(k5, (C_out,), jnp.float32)

    out = conv_block_forward(x, weight, bias, gamma, beta, padding=padding)
    out = jax.block_until_ready(out)

    ref = _reference(x, weight, bias, gamma, beta, padding=padding)
    assert out.shape == (N, C_out, H, W)
    assert jnp.allclose(out, ref, atol=1e-4, rtol=1e-4), "mismatch vs reference"

    print("KERNEL_OK")
</pallas_src>

<mosaic_0001>
module attributes {stable_mosaic.version = 11 : i64} {
  func.func @_conv_bn_act_kernel(%arg0: i32, %arg1: memref<36x512xf32, #tpu.memory_space<vmem>>, %arg2: memref<8x36xf32, #tpu.memory_space<vmem>>, %arg3: memref<8x1xf32, #tpu.memory_space<vmem>>, %arg4: memref<8x1xf32, #tpu.memory_space<vmem>>, %arg5: memref<8x512xf32, #tpu.memory_space<vmem>>, %arg6: memref<8x1xf32, #tpu.memory_space<vmem>>, %arg7: memref<8x1xf32, #tpu.memory_space<vmem>>) attributes {dimension_semantics = [#tpu.dimension_semantics<arbitrary>], iteration_bounds = array<i64: 1>, scalar_prefetch = 0 : i64, scratch_operands = 2 : i64, tpu.core_type = #tpu.core_type<tc>, window_params = [{transform_indices = @transform_0, window_bounds = array<i64: 36, 512>}, {pipeline_mode = #tpu.pipeline_mode<synchronous>, transform_indices = @transform_1, window_bounds = array<i64: 8, 36>}, {pipeline_mode = #tpu.pipeline_mode<synchronous>, transform_indices = @transform_2, window_bounds = array<i64: 8, 1>}, {pipeline_mode = #tpu.pipeline_mode<synchronous>, transform_indices = @transform_3, window_bounds = array<i64: 8, 1>}, {pipeline_mode = #tpu.pipeline_mode<synchronous>, transform_indices = @transform_4, window_bounds = array<i64: 8, 512>}]} {
    %c0_i32 = arith.constant 0 : i32
    %0 = arith.cmpi eq, %arg0, %c0_i32 : i32
    %1 = arith.extui %0 : i1 to i32
    %c0_i32_0 = arith.constant 0 : i32
    %2 = arith.cmpi ne, %1, %c0_i32_0 : i32
    scf.if %2 {
      %cst_17 = arith.constant 0.000000e+00 : f32
      %24 = vector.broadcast %cst_17 : f32 to vector<8x1xf32>
      %c0_18 = arith.constant 0 : index
      %c0_19 = arith.constant 0 : index
      %25 = vector.load %arg6[%c0_18, %c0_19] : memref<8x1xf32, #tpu.memory_space<vmem>>, vector<8x1xf32>
      tpu.vector_store %arg6[%c0_18, %c0_19], %24 {strides = array<i32>} : memref<8x1xf32, #tpu.memory_space<vmem>>, vector<8x1xf32>,
      %cst_20 = arith.constant 0.000000e+00 : f32
      %26 = vector.broadcast %cst_20 : f32 to vector<8x1xf32>
      %c0_21 = arith.constant 0 : index
      %c0_22 = arith.constant 0 : index
      %27 = vector.load %arg7[%c0_21, %c0_22] : memref<8x1xf32, #tpu.memory_space<vmem>>, vector<8x1xf32>
      tpu.vector_store %arg7[%c0_21, %c0_22], %26 {strides = array<i32>} : memref<8x1xf32, #tpu.memory_space<vmem>>, vector<8x1xf32>,
    } else {
    }
    %c0 = arith.constant 0 : index
    %c0_1 = arith.constant 0 : index
    %3 = vector.load %arg2[%c0, %c0_1] : memref<8x36xf32, #tpu.memory_space<vmem>>, vector<8x36xf32>
    %c0_2 = arith.constant 0 : index
    %c0_3 = arith.constant 0 : index
    %4 = vector.load %arg1[%c0_2, %c0_3] : memref<36x512xf32, #tpu.memory_space<vmem>>, vector<36x512xf32>
    %cst = arith.constant dense<0.000000e+00> : vector<8x512xf32>
    %5 = tpu.matmul %3, %4, %cst {dimension_numbers = #tpu.dot_dimension_numbers<[1], [0], [0], [1], [0, 0, 1, 1], [], []>} : vector<8x36xf32>, vector<36x512xf32>, vector<8x512xf32> -> vector<8x512xf32>
    %c512_i32 = arith.constant 512 : i32
    %6 = arith.muli %arg0, %c512_i32 : i32
    %7 = tpu.assume_multiple %6, 512 : i32
    %c0_4 = arith.constant 0 : index
    %8 = arith.index_cast %7 : i32 to index
    %9 = vector.load %arg5[%c0_4, %8] : memref<8x512xf32, #tpu.memory_space<vmem>>, vector<8x512xf32>
    tpu.vector_store %arg5[%c0_4, %8], %5 {strides = array<i32>} : memref<8x512xf32, #tpu.memory_space<vmem>>, vector<8x512xf32>,
    %c0_5 = arith.constant 0 : index
    %c0_6 = arith.constant 0 : index
    %10 = vector.load %arg6[%c0_5, %c0_6] : memref<8x1xf32, #tpu.memory_space<vmem>>, vector<8x1xf32>
    %cst_7 = arith.constant dense<0.000000e+00> : vector<8xf32>
    %11 = vector.multi_reduction <add>, %5, %cst_7 [1] : vector<8x512xf32> to vector<8xf32>
    %12 = vector.shape_cast %11 : vector<8xf32> to vector<8x1xf32>
    %13 = arith.addf %10, %12 : vector<8x1xf32>
    %c0_8 = arith.constant 0 : index
    %c0_9 = arith.constant 0 : index
    %14 = vector.load %arg6[%c0_8, %c0_9] : memref<8x1xf32, #tpu.memory_space<vmem>>, vector<8x1xf32>
    tpu.vector_store %arg6[%c0_8, %c0_9], %13 {strides = array<i32>} : memref<8x1xf32, #tpu.memory_space<vmem>>, vector<8x1xf32>,
    %c0_10 = arith.constant 0 : index
    %c0_11 = arith.constant 0 : index
    %15 = vector.load %arg7[%c0_10, %c0_11] : memref<8x1xf32, #tpu.memory_space<vmem>>, vector<8x1xf32>
    %16 = arith.mulf %5, %5 : vector<8x512xf32>
    %cst_12 = arith.constant dense<0.000000e+00> : vector<8xf32>
    %17 = vector.multi_reduction <add>, %16, %cst_12 [1] : vector<8x512xf32> to vector<8xf32>
    %18 = vector.shape_cast %17 : vector<8xf32> to vector<8x1xf32>
    %19 = arith.addf %15, %18 : vector<8x1xf32>
    %c0_13 = arith.constant 0 : index
    %c0_14 = arith.constant 0 : index
    %20 = vector.load %arg7[%c0_13, %c0_14] : memref<8x1xf32, #tpu.memory_space<vmem>>, vector<8x1xf32>
    tpu.vector_store %arg7[%c0_13, %c0_14], %19 {strides = array<i32>} : memref<8x1xf32, #tpu.memory_space<vmem>>, vector<8x1xf32>,
    %c0_i32_15 = arith.constant 0 : i32
    %21 = arith.cmpi eq, %arg0, %c0_i32_15 : i32
    %22 = arith.extui %21 : i1 to i32
    %c0_i32_16 = arith.constant 0 : i32
    %23 = arith.cmpi ne, %22, %c0_i32_16 : i32
    scf.if %23 {
      %c0_17 = arith.constant 0 : index
      %c0_18 = arith.constant 0 : index
      %24 = vector.load %arg6[%c0_17, %c0_18] : memref<8x1xf32, #tpu.memory_space<vmem>>, vector<8x1xf32>
      %cst_19 = arith.constant 0.001953125 : f32
      %25 = vector.broadcast %cst_19 : f32 to vector<8x1xf32>
      %26 = arith.mulf %24, %25 : vector<8x1xf32>
      %c0_20 = arith.constant 0 : index
      %c0_21 = arith.constant 0 : index
      %27 = vector.load %arg7[%c0_20, %c0_21] : memref<8x1xf32, #tpu.memory_space<vmem>>, vector<8x1xf32>
      %cst_22 = arith.constant 0.001953125 : f32
      %28 = vector.broadcast %cst_22 : f32 to vector<8x1xf32>
      %29 = arith.mulf %27, %28 : vector<8x1xf32>
      %30 = arith.mulf %26, %26 : vector<8x1xf32>
      %31 = arith.subf %29, %30 : vector<8x1xf32>
      %cst_23 = arith.constant 9.99999974E-6 : f32
      %32 = vector.broadcast %cst_23 : f32 to vector<8x1xf32>
      %33 = arith.addf %31, %32 : vector<8x1xf32>
      %34 = math.rsqrt %33 : vector<8x1xf32>
      %c0_24 = arith.constant 0 : index
      %c0_25 = arith.constant 0 : index
      %35 = vector.load %arg3[%c0_24, %c0_25] : memref<8x1xf32, #tpu.memory_space<vmem>>, vector<8x1xf32>
      %36 = arith.mulf %35, %34 : vector<8x1xf32>
      %c0_26 = arith.constant 0 : index
      %c0_27 = arith.constant 0 : index
      %37 = vector.load %arg4[%c0_26, %c0_27] : memref<8x1xf32, #tpu.memory_space<vmem>>, vector<8x1xf32>
      %38 = arith.mulf %26, %36 : vector<8x1xf32>
      %39 = arith.subf %37, %38 : vector<8x1xf32>
      %c0_28 = arith.constant 0 : index
      %c0_29 = arith.constant 0 : index
      %40 = vector.load %arg5[%c0_28, %c0_29] : memref<8x512xf32, #tpu.memory_space<vmem>>, vector<8x512xf32>
      %41 = vector.broadcast %36 : vector<8x1xf32> to vector<8x512xf32>
      %42 = arith.mulf %40, %41 : vector<8x512xf32>
      %43 = vector.broadcast %39 : vector<8x1xf32> to vector<8x512xf32>
      %44 = arith.addf %42, %43 : vector<8x512xf32>
      %cst_30 = arith.constant 0.000000e+00 : f32
      %45 = vector.broadcast %cst_30 : f32 to vector<8x512xf32>
      %46 = arith.maximumf %44, %45 : vector<8x512xf32>
      %c0_31 = arith.constant 0 : index
      %c0_32 = arith.constant 0 : index
      %47 = vector.load %arg5[%c0_31, %c0_32] : memref<8x512xf32, #tpu.memory_space<vmem>>, vector<8x512xf32>
      tpu.vector_store %arg5[%c0_31, %c0_32], %46 {strides = array<i32>} : memref<8x512xf32, #tpu.memory_space<vmem>>, vector<8x512xf32>,
    } else {
    }
    return
  }
  func.func @transform_0(%arg0: i32) -> (i32, i32) {
    %c0_i32 = arith.constant 0 : i32
    %c0_i32_0 = arith.constant 0 : i32
    return %c0_i32, %arg0 : i32, i32
  }
  func.func @transform_1(%arg0: i32) -> (i32, i32) {
    %c0_i32 = arith.constant 0 : i32
    %c0_i32_0 = arith.constant 0 : i32
    %c0_i32_1 = arith.constant 0 : i32
    return %c0_i32, %c0_i32_0 : i32, i32
  }
  func.func @transform_2(%arg0: i32) -> (i32, i32) {
    %c0_i32 = arith.constant 0 : i32
    %c0_i32_0 = arith.constant 0 : i32
    %c0_i32_1 = arith.constant 0 : i32
    return %c0_i32, %c0_i32_0 : i32, i32
  }
  func.func @transform_3(%arg0: i32) -> (i32, i32) {
    %c0_i32 = arith.constant 0 : i32
    %c0_i32_0 = arith.constant 0 : i32
    %c0_i32_1 = arith.constant 0 : i32
    return %c0_i32, %c0_i32_0 : i32, i32
  }
  func.func @transform_4(%arg0: i32) -> (i32, i32) {
    %c0_i32 = arith.constant 0 : i32
    %c0_i32_0 = arith.constant 0 : i32
    %c0_i32_1 = arith.constant 0 : i32
    return %c0_i32, %c0_i32_0 : i32, i32
  }
}

</mosaic_0001>

<bundles_post_ra>
// kernel: tpu_custom_call.1
= control target key start
LH: loop header
LB: loop body
LE: loop exit
PB: predicated region body
PF: predicated region fallthrough
CT: control target
= control target key end

     0   :  { %9 = vsyncpa [#allocation5], 0  ;;  %s383_s0 = inlined_call_operand.hbm [shape: f32[36,512], index: 0, kind: input, shape index: {}]   ;;  %s384_s1 = inlined_call_operand.vmem [shape: f32[8,36], index: 1, kind: input, shape index: {}]   ;;  %s385_s2 = inlined_call_operand.vmem [shape: f32[8,1], index: 2, kind: input, shape index: {}]   ;;  %s386_s3 = inlined_call_operand.vmem [shape: f32[8,1], index: 3, kind: input, shape index: {}]   ;;  %s387_s4 = inlined_call_operand.hbm [shape: f32[8,512], index: 4, kind: output, shape index: {}]  }
   0x1   :  { %10 = vsyncpa [#allocation6], 0  ;;  %s15_s17 = sshll.u32 %s383_s0, 4  ;;  %s333_s18 = smov [#allocation4]   ;;  %s16_s17 = int_to_ptr.hbm [resolvable:$true] %s15_s17 }
   0x2   :  { %s17_s19 = sshll.u32 %s333_s18, 4  ;;  %s334_s20 = smov 512   ;;  %s18_s19 = int_to_ptr.vmem [resolvable:$true] %s17_s19 }
   0x3   :  { %s335_s21 = smov 32  }
   0x4   :  { %23 = dma.hbm_to_vmem [thread:$0]  %s16_s17, 2560, %s18_s19, [#allocation5], %s334_s20, %s334_s20, %s335_s21  }
   0x5   :  { %329 = dma.done.wait [#allocation5], 2560  }
   0x6   :  { %330 = vsyncadd [#allocation5], 4294964736  ;;  %vm66_vm0 = vcmask 1043456   ;;  %v60_v0 = vld [vmem:[#allocation4 + $0x90] sm:$0xf]  ;;  %v57_v6 = vld [vmem:[#allocation4 + $0x78] sm:$0xff] }
   0x7   :  { %v56_v1 = vld [vmem:[#allocation4 + $0x70] sm:$0xff]  ;;  %v61_v2 = vld [vmem:[#allocation4 + $0x98] sm:$0xf]  ;;  %267 = vmatpush.msk.msra.mxu2 %vm66_vm0, %v60_v0  ;;  %v58_v3 = vld [vmem:[#allocation4 + $0x80] sm:$0xf]  ;;  %vm62_vm1 = vcmask 293888  }
   0x8   :  { %269 = vmatpush.msk.msra.mxu3 %vm66_vm0, %v61_v2  ;;  %v59_v4 = vld [vmem:[#allocation4 + $0x88] sm:$0xf]  ;;  %v52_v5 = vld [vmem:[#allocation4 + $0x50] sm:$0xff]  ;;  %263 = vmatpush.msk.msra.mxu0 %vm66_vm0, %v58_v3  ;;  %v54_v7 = vld [vmem:[#allocation4 + $0x60] sm:$0xff]  ;;  %vm38_vm2 = vcmask 7168   ;;  %v336_v21 = vmov 0.0  }
   0x9   :  { %265 = vmatpush.msk.msra.mxu1 %vm66_vm0, %v59_v4  ;;  %v55_v8 = vld [vmem:[#allocation4 + $0x68] sm:$0xff]  ;;  %131 = vmatpush.msra.mxu2 %v56_v1  ;;  %v53_v9 = vld [vmem:[#allocation4 + $0x58] sm:$0xff]  ;;  %v50_v10 = vld [vmem:[#allocation4 + $0x40] sm:$0xff]  ;;  %39 = vst.msk [vmem:[#allocation2] sm:$0xff] %vm38_vm2, %v336_v21  ;;  %v337_v36 = vmov 0  }
   0xa   :  { %151 = vmatpush.msra.mxu3 %v57_v6  ;;  %91 = vmatpush.msra.mxu0 %v54_v7  ;;  %v48_v11 = vld [vmem:[#allocation4 + $0x30] sm:$0xff]  ;;  %v51_v12 = vld [vmem:[#allocation4 + $0x48] sm:$0xff]  ;;  %v49_v13 = vld [vmem:[#allocation4 + $0x38] sm:$0xff]  ;;  %40 = vst.msk [vmem:[#allocation3] sm:$0xff] %vm38_vm2, %v336_v21 }
   0xb   :  { %111 = vmatpush.msra.mxu1 %v55_v8  ;;  %132 = vmatpush.msra.mxu2 %v52_v5  ;;  %v46_v14 = vld [vmem:[#allocation4 + $0x20] sm:$0xff]  ;;  %v47_v15 = vld [vmem:[#allocation4 + $0x28] sm:$0xff]  ;;  %v44_v16 = vld [vmem:[#allocation4 + $0x10] sm:$0xff] }
   0xc   :  { %152 = vmatpush.msra.mxu3 %v53_v9  ;;  %92 = vmatpush.msra.mxu0 %v50_v10  ;;  %v45_v17 = vld [vmem:[#allocation4 + $0x18] sm:$0xff]  ;;  %v41_v18 = vld [vmem:[%s384_s1] sm:$0xff]  ;;  %v42_v19 = vld [vmem:[#allocation4] sm:$0xff] }
   0xd   :  { %112 = vmatpush.msra.mxu1 %v51_v12  ;;  %133 = vmatpush.msra.mxu2 %v48_v11  ;;  %v43_v20 = vld [vmem:[#allocation4 + $0x8] sm:$0xff]  ;;  %v209_v56 = vld [vmem:[%s385_s2] sm:$0xff]  ;;  %s338_s2 = smov [#allocation7]  }
   0xe   :  { %153 = vmatpush.msra.mxu3 %v49_v13  ;;  %93 = vmatpush.msra.mxu0 %v46_v14  ;;  %v211_v60 = vld [vmem:[%s386_s3] sm:$0xff]  ;;  %s249_s26 = sshll.u32 %s338_s2, 4  ;;  %s251_s3 = sshll.u32 %s387_s4, 4  ;;  %s250_s26 = int_to_ptr.vmem [resolvable:$true] %s249_s26  ;;  %s252_s3 = int_to_ptr.hbm [resolvable:$true] %s251_s3 }
   0xf   :  { %113 = vmatpush.msra.mxu1 %v47_v15  ;;  %134 = vmatpush.msra.mxu2 %v44_v16 }
  0x10   :  { %154 = vmatpush.msra.mxu3 %v45_v17  ;;  %268 = vmatmul.msk.f32.vlgmr.msra.gmra.mxu2 %vm62_vm1, %v41_v18  ;;  %v168_v37 = vld [vmem:[#allocation2] sm:$0xff] }
  0x11   :  { %270 = vmatmul.msk.f32.vlgmr.msra.gmra.mxu3 %vm62_vm1, %v41_v18  ;;  %94 = vmatpush.msra.mxu0 %v42_v19  ;;  %v177_v40 = vld [vmem:[#allocation3] sm:$0xff] }
  0x12   :  { %114 = vmatpush.msra.mxu1 %v43_v20  ;;  %264 = vmatmul.msk.f32.vlgmr.msra.gmra.mxu0 %vm62_vm1, %v41_v18 }
  0x13   :  { %266 = vmatmul.msk.f32.vlgmr.msra.gmra.mxu1 %vm62_vm1, %v41_v18  ;;  %277 = vset.pattern.permute.xlu1 %v337_v36 }
  0x14   :  { %278 = vset.pattern.permute.xlu0 %v337_v36 }
  0x8f   :  { %v96_v22 = vpop.f32.mrf.mxu0 }
  0x90   :  { %v116_v23 = vpop.f32.mrf.mxu1  ;;  %v178_v25 = vmul.f32 %v96_v22, %v96_v22 }
  0x91   :  { %v169_v24 = vadd.f32 %v116_v23, %v96_v22  ;;  %v179_v26 = vmul.f32 %v116_v23, %v116_v23 }
  0x93   :  { %v136_v27 = vpop.f32.mrf.mxu2  ;;  %v182_v30 = vadd.f32 %v179_v26, %v178_v25 }
  0x94   :  { %v156_v28 = vpop.f32.mrf.mxu3  ;;  %v170_v29 = vadd.f32 %v169_v24, %v136_v27  ;;  %v180_v31 = vmul.f32 %v136_v27, %v136_v27 }
  0x95   :  { %v181_v33 = vmul.f32 %v156_v28, %v156_v28 }
  0x96   :  { %v171_v32 = vadd.f32 %v170_v29, %v156_v28  ;;  %v183_v34 = vadd.f32 %v182_v30, %v180_v31 }
  0x98   :  { %172 = vadd.xlane.f32.xlu0 %v171_v32  ;;  %v184_v35 = vadd.f32 %v183_v34, %v181_v33 }
  0xa0   :  { %185 = vadd.xlane.f32.xlu0 %v184_v35 }
 0x10b   :  { %v173_v38 = vpop.xlane.xlu0 %172 }
 0x10c   :  { %v174_v39 = vadd.f32 %v173_v38, %v168_v37 }
 0x10e   :  { %176 = vst.msk [vmem:[#allocation2] sm:$0xff] %vm38_vm2, %v174_v39 }
 0x113   :  { %v186_v41 = vpop.xlane.xlu0 %185 }
 0x114   :  { %v187_v42 = vadd.f32 %v186_v41, %v177_v40 }
 0x115   :  { %v192_v43 = vld [vmem:[#allocation2] sm:$0xff] }
 0x116   :  { %188 = vst.msk [vmem:[#allocation3] sm:$0xff] %vm38_vm2, %v187_v42  ;;  %v193_v44 = vmul.f32 0.001953125, %v192_v43 }
 0x118   :  { %v196_v47 = vmul.f32 %v193_v44, %v193_v44 }
 0x11d   :  { %v194_v45 = vld [vmem:[#allocation3] sm:$0xff] }
 0x11e   :  { %v195_v46 = vmul.f32 0.001953125, %v194_v45 }
 0x120   :  { %v197_v48 = vsub.f32 %v195_v46, %v196_v47 }
 0x122   :  { %v198_v49 = vadd.f32 1e-05, %v197_v48 }
 0x124   :  { %279 = vrsqrt.f32 %v198_v49  ;;  %vm205_vm4 = vweird.f32 %v198_v49 }
 0x12a   :  { %v280_v50 = vpop.eup %279 }
 0x12b   :  { %v200_v51 = vmul.f32 %v280_v50, %v198_v49  ;;  %vm206_vm3 = vweird.f32 %v280_v50 }
 0x12c   :  { %vm207_vm5 = vmor %vm205_vm4, %vm206_vm3 }
 0x12d   :  { %v201_v52 = vmul.f32 %v280_v50, %v200_v51 }
 0x12f   :  { %v202_v53 = vmul.f32 0.5, %v201_v52 }
 0x131   :  { %v203_v54 = vsub.f32 1.5, %v202_v53 }
 0x133   :  { %v204_v55 = vmul.f32 %v280_v50, %v203_v54 }
 0x135   :  { %v208_v57 = vsel %vm207_vm5, %v280_v50, %v204_v55 }
 0x136   :  { %v210_v58 = vmul.f32 %v209_v56, %v208_v57 }
 0x138   :  { %220 = vperm.xlu1 %277, %v210_v58   ;;  %v212_v59 = vmul.f32 %v210_v58, %v193_v44 }
 0x13a   :  { %v213_v61 = vsub.f32 %v211_v60, %v212_v59 }
 0x140   :  { %229 = vperm.xlu1 %277, %v213_v61  }
 0x1aa   :  { %v221_v62 = vpop.permute.xlu1 %220 }
 0x1ab   :  { %v223_v63 = vmul.f32 %v221_v62, %v96_v22  ;;  %v224_v0 = vmul.f32 %v221_v62, %v116_v23  ;;  %v225_v1 = vmul.f32 %v221_v62, %v136_v27  ;;  %v226_v2 = vmul.f32 %v221_v62, %v156_v28 }
 0x1b2   :  { %v230_v3 = vpop.permute.xlu1 %229 }
 0x1b3   :  { %v232_v4 = vadd.f32 %v230_v3, %v223_v63  ;;  %v233_v5 = vadd.f32 %v230_v3, %v224_v0  ;;  %v234_v6 = vadd.f32 %v230_v3, %v225_v1  ;;  %v235_v7 = vadd.f32 %v230_v3, %v226_v2 }
 0x1b5   :  { %v236_v8 = vmax.f32 %v232_v4, 0.0  ;;  %v237_v9 = vmax.f32 %v233_v5, 0.0  ;;  %v238_v10 = vmax.f32 %v234_v6, 0.0  ;;  %v239_v11 = vmax.f32 %v235_v7, 0.0 }
 0x1b7   :  { %240 = vst [vmem:[#allocation7] sm:$0xff] %v236_v8 }
 0x1b8   :  { %241 = vst [vmem:[#allocation7 + $0x8] sm:$0xff] %v237_v9 }
 0x1b9   :  { %242 = vst [vmem:[#allocation7 + $0x10] sm:$0xff] %v238_v10 }
 0x1ba   :  { %243 = vst [vmem:[#allocation7 + $0x18] sm:$0xff] %v239_v11 }
 0x1bb   :  { %254 = dma.vmem_to_hbm [thread:$0]  %s250_s26, 512, %s252_s3, [#allocation6]  }
 0x1bc   :  { %331 = dma.done.wait [#allocation6], 512  }
 0x1bd   :  { %332 = vsyncadd [#allocation6], 4294966784 }
 0x1be   :  { %259 = vsyncpa [#allocation5], 1 }
 0x1bf   :  { %260 = vsyncpa [#allocation6], 1 }

</bundles_post_ra>
